<compile_context>
chip_gen: v6e
topology: v6e:2x2x1
jax: 0.10.0
libtpu: 0.0.40
codegen_flags: <defaults>
</compile_context>

<pallas_src>
import math
import jax
import jax.numpy as jnp
from jax import lax
from jax.experimental import pallas as pl
from jax.experimental.pallas import tpu as pltpu


def get_temperature(epoch):
    return 30.0 - 2.9 * epoch if epoch < 10 else 1.0


# ----------------------------- Pallas kernels -----------------------------

def dyn_conv3d_kernel(p_ref, w_ref, b_ref, o_ref, sum_ref, sq_ref):
    # p_ref : (1, K, tTHW)    im2col patch tile for one sample (K = Cin*27; tTHW lane-dense)
    # w_ref : (1, Cout, K)    mixed filter matrix for this sample
    # b_ref : (1, Cout, 1)    mixed bias
    # o_ref : (1, Cout, tTHW) conv output tile (already channel-major -> no final transpose)
    # sum_ref / sq_ref : (1, Cout, 1) per-sample sums for BatchNorm batch statistics,
    #                    accumulated across the THW-tile grid axis (resident output block).
    j = pl.program_id(1)
    acc = jnp.dot(w_ref[0], p_ref[0], preferred_element_type=jnp.float32)   # (Cout, tTHW) on MXU
    y = acc + b_ref[0]                                 # lane-broadcast of (Cout, 1) bias
    o_ref[0] = y
    part_sum = jnp.sum(y, axis=1, keepdims=True)       # (Cout, 1), XLU lane-reduce
    part_sq = jnp.sum(y * y, axis=1, keepdims=True)

    @pl.when(j == 0)
    def _():
        sum_ref[0] = part_sum
        sq_ref[0] = part_sq

    @pl.when(j > 0)
    def _():
        sum_ref[0] = sum_ref[0] + part_sum
        sq_ref[0] = sq_ref[0] + part_sq


def bn_relu_kernel(y_ref, scale_ref, shift_ref, o_ref):
    # y_ref: (1, Cout, tTHW); scale/shift: (Cout, 1) folded BN affine, broadcast along lanes
    o_ref[0] = jnp.maximum(y_ref[0] * scale_ref[...] + shift_ref[...], 0.0)


# ----------------------------- Pallas wrappers -----------------------------

def _pick_thw_block(thw, max_block=2048):
    # lane-dense tile: full extent if small, else the largest multiple-of-128 divisor <= max_block
    if thw <= max_block:
        return thw
    for blk in range(max_block, 0, -128):
        if thw % blk == 0:
            return blk
    return thw


def dynamic_conv3d_pallas(patches, w_mat, bias):
    # patches: (N, K, THW); w_mat: (N, Cout, K); bias: (N, Cout)
    N, K, THW = patches.shape
    Cout = w_mat.shape[1]
    b3 = bias.reshape(N, Cout, 1)
    t_thw = _pick_thw_block(THW)
    n_thw = THW // t_thw
    return pl.pallas_call(
        dyn_conv3d_kernel,
        out_shape=(
            jax.ShapeDtypeStruct((N, Cout, THW), jnp.float32),
            jax.ShapeDtypeStruct((N, Cout, 1), jnp.float32),
            jax.ShapeDtypeStruct((N, Cout, 1), jnp.float32),
        ),
        grid_spec=pltpu.PrefetchScalarGridSpec(
            num_scalar_prefetch=0,
            grid=(N, n_thw),
            in_specs=[
                pl.BlockSpec((1, K, t_thw), lambda b, j: (b, 0, j)),
                pl.BlockSpec((1, Cout, K), lambda b, j: (b, 0, 0)),
                pl.BlockSpec((1, Cout, 1), lambda b, j: (b, 0, 0)),
            ],
            out_specs=(
                pl.BlockSpec((1, Cout, t_thw), lambda b, j: (b, 0, j)),
                pl.BlockSpec((1, Cout, 1), lambda b, j: (b, 0, 0)),   # resident across j (accumulator)
                pl.BlockSpec((1, Cout, 1), lambda b, j: (b, 0, 0)),
            ),
        ),
        compiler_params=pltpu.CompilerParams(
            dimension_semantics=("parallel", "arbitrary")),
    )(patches, w_mat, b3)


def bn_relu_pallas(y, scale, shift):
    N, Cout, THW = y.shape
    t_thw = _pick_thw_block(THW)
    n_thw = THW // t_thw
    return pl.pallas_call(
        bn_relu_kernel,
        out_shape=jax.ShapeDtypeStruct((N, Cout, THW), jnp.float32),
        grid_spec=pltpu.PrefetchScalarGridSpec(
            num_scalar_prefetch=0,
            grid=(N, n_thw),
            in_specs=[
                pl.BlockSpec((1, Cout, t_thw), lambda b, j: (b, 0, j)),
                pl.BlockSpec((Cout, 1), lambda b, j: (0, 0)),
                pl.BlockSpec((Cout, 1), lambda b, j: (0, 0)),
            ],
            out_specs=pl.BlockSpec((1, Cout, t_thw), lambda b, j: (b, 0, j)),
        ),
        compiler_params=pltpu.CompilerParams(
            dimension_semantics=("parallel", "parallel")),
    )(y, scale.reshape(Cout, 1), shift.reshape(Cout, 1))


# ----------------------------- JAX glue (routing net, weight mixing) -----------------------------

def routing_and_mix(x, params, epochs_num):
    # x: (N, Cin, T, H, W)
    std_x = jnp.std(x, axis=2, ddof=1)            # torch.Tensor.std is unbiased by default
    h = lax.conv_general_dilated(std_x, params["se_w1"], (1, 1), "VALID",
                                 dimension_numbers=("NCHW", "OIHW", "NCHW"))
    h = jax.nn.relu(h + params["se_b1"][None, :, None, None])
    h = lax.conv_general_dilated(h, params["se_w2"], (1, 1), "VALID",
                                 dimension_numbers=("NCHW", "OIHW", "NCHW"))
    h = jax.nn.relu(h + params["se_b2"][None, :, None, None])
    feat = jnp.max(h, axis=(2, 3))                # AdaptiveMaxPool2d(1) + Squeeze
    phi = feat @ params["lin_w"].T + params["lin_b"]
    tau = get_temperature(epochs_num)
    phi = jax.nn.softmax(phi / tau, axis=1)                           # (N, num_weights)
    dw = jnp.einsum("bn,noiklm->boiklm", phi, params["w_dyn"])        # (N, Cout, Cin, 3,3,3)
    db = jnp.einsum("bn,no->bo", phi, params["b_dyn"])                # (N, Cout)
    return dw, db


def shape_dynamic_feed_forward(x, params, epochs_num):
    # matches ShapeDynamicFeedForward.forward (BatchNorm3d in training mode: batch stats)
    N, Cin, T, H, W = x.shape
    Cout = params["gamma"].shape[0]
    THW = T * H * W
    dw, db = routing_and_mix(x, params, epochs_num)

    # --- im2col in XLA, channel-first: patches (N, K=Cin*27, THW), K index = ci*27 + kt*9 + kh*3 + kw
    #     (no transpose of x or dw needed; w_mat is a plain reshape of the mixed filters)
    x_pad = jnp.pad(x, ((0, 0), (0, 0), (1, 1), (1, 1), (1, 1)))
    slices = []
    for kt in range(3):
        for kh in range(3):
            for kw in range(3):
                slices.append(x_pad[:, :, kt:kt + T, kh:kh + H, kw:kw + W])
    patches = jnp.stack(slices, axis=2).reshape(N, Cin * 27, THW)     # (N, K, THW)
    w_mat = dw.reshape(N, Cout, Cin * 27)                             # (N, Cout, K)

    y, ysum, ysq = dynamic_conv3d_pallas(patches, w_mat, db)          # y: (N, Cout, THW)

    # BatchNorm3d (training): biased batch stats, computed from the per-sample kernel sums
    total = N * THW
    mean = jnp.sum(ysum[:, :, 0], axis=0) / total                     # (Cout,)
    var = jnp.maximum(jnp.sum(ysq[:, :, 0], axis=0) / total - mean * mean, 0.0)
    scale = params["gamma"] / jnp.sqrt(var + 1e-5)
    shift = params["beta"] - mean * scale

    out = bn_relu_pallas(y, scale, shift)                             # (N, Cout, THW)
    return out.reshape(N, Cout, T, H, W)                              # already NCDHW order


# ----------------------------- pure-JAX reference (for validation) -----------------------------

def reference_forward(x, params, epochs_num):
    N, Cin, T, H, W = x.shape
    dw, db = routing_and_mix(x, params, epochs_num)
    ys = []
    for b in range(N):
        yb = lax.conv_general_dilated(x[b:b + 1], dw[b], (1, 1, 1),
                                      [(1, 1), (1, 1), (1, 1)],
                                      dimension_numbers=("NCDHW", "OIDHW", "NCDHW"))
        ys.append(yb)
    y = jnp.concatenate(ys, 0) + db[:, :, None, None, None]
    mean = jnp.mean(y, axis=(0, 2, 3, 4), keepdims=True)
    var = jnp.var(y, axis=(0, 2, 3, 4), keepdims=True)
    yn = (y - mean) / jnp.sqrt(var + 1e-5)
    yn = yn * params["gamma"][None, :, None, None, None] + params["beta"][None, :, None, None, None]
    return jax.nn.relu(yn)


# ----------------------------- main -----------------------------

if __name__ == "__main__":
    # small shapes consistent with the module
    N, CIN, DIMS, NW = 2, 4, 8, 4          # batch, input_dim, dims (out channels), num_weights
    T, H, W = 8, 16, 16
    EPOCH = 3

    key = jax.random.PRNGKey(0)
    ks = jax.random.split(key, 9)
    params = {
        # kaiming_normal-ish: std = sqrt(2 / fan_in), fan_in = dims * input_dim * 27
        "w_dyn": jax.random.normal(ks[0], (NW, DIMS, CIN, 3, 3, 3), jnp.float32)
                 * math.sqrt(2.0 / (DIMS * CIN * 27)),
        "b_dyn": jax.random.normal(ks[1], (NW, DIMS), jnp.float32),
        "se_w1": jax.random.normal(ks[2], (16, CIN, 5, 5), jnp.float32)
                 * math.sqrt(2.0 / (CIN * 25)),
        "se_b1": 0.01 * jax.random.normal(ks[3], (16,), jnp.float32),
        "se_w2": jax.random.normal(ks[4], (32, 16, 5, 5), jnp.float32)
                 * math.sqrt(2.0 / (16 * 25)),
        "se_b2": 0.01 * jax.random.normal(ks[5], (32,), jnp.float32),
        "lin_w": jax.random.normal(ks[6], (NW, 32), jnp.float32) * math.sqrt(1.0 / 32),
        "lin_b": 0.01 * jax.random.normal(ks[7], (NW,), jnp.float32),
        "gamma": jnp.ones((DIMS,), jnp.float32),    # BatchNorm3d default init
        "beta": jnp.zeros((DIMS,), jnp.float32),
    }

    x = jax.random.normal(ks[8], (N, CIN, T, H, W), jnp.float32)

    out = shape_dynamic_feed_forward(x, params, EPOCH)
    out = jax.block_until_ready(out)

    ref = jax.block_until_ready(reference_forward(x, params, EPOCH))
    max_err = float(jnp.max(jnp.abs(out - ref)))
    assert out.shape == (N, DIMS, T, H, W), out.shape
    assert max_err < 1e-2, f"max abs error {max_err}"

    print("KERNEL_OK")
</pallas_src>

<mosaic_0001>
module attributes {stable_mosaic.version = 11 : i64} {
  func.func @dyn_conv3d_kernel(%arg0: i32, %arg1: i32, %arg2: memref<1x108x2048xf32, #tpu.memory_space<vmem>>, %arg3: memref<1x8x108xf32, #tpu.memory_space<vmem>>, %arg4: memref<1x8x1xf32, #tpu.memory_space<vmem>>, %arg5: memref<1x8x2048xf32, #tpu.memory_space<vmem>>, %arg6: memref<1x8x1xf32, #tpu.memory_space<vmem>>, %arg7: memref<1x8x1xf32, #tpu.memory_space<vmem>>) attributes {dimension_semantics = [#tpu.dimension_semantics<parallel>, #tpu.dimension_semantics<arbitrary>], iteration_bounds = array<i64: 2, 1>, scalar_prefetch = 0 : i64, scratch_operands = 0 : i64, tpu.core_type = #tpu.core_type<tc>, window_params = [{transform_indices = @transform_0, window_bounds = array<i64: 1, 108, 2048>}, {transform_indices = @transform_1, window_bounds = array<i64: 1, 8, 108>}, {transform_indices = @transform_2, window_bounds = array<i64: 1, 8, 1>}, {transform_indices = @transform_3, window_bounds = array<i64: 1, 8, 2048>}, {transform_indices = @transform_4, window_bounds = array<i64: 1, 8, 1>}, {transform_indices = @transform_5, window_bounds = array<i64: 1, 8, 1>}]} {
    %c0 = arith.constant 0 : index
    %c0_0 = arith.constant 0 : index
    %c0_1 = arith.constant 0 : index
    %0 = vector.load %arg3[%c0, %c0_0, %c0_1] : memref<1x8x108xf32, #tpu.memory_space<vmem>>, vector<1x8x108xf32>
    %1 = vector.shape_cast %0 : vector<1x8x108xf32> to vector<8x108xf32>
    %c0_2 = arith.constant 0 : index
    %c0_3 = arith.constant 0 : index
    %c0_4 = arith.constant 0 : index
    %2 = vector.load %arg2[%c0_2, %c0_3, %c0_4] : memref<1x108x2048xf32, #tpu.memory_space<vmem>>, vector<1x108x2048xf32>
    %3 = vector.shape_cast %2 : vector<1x108x2048xf32> to vector<108x2048xf32>
    %cst = arith.constant dense<0.000000e+00> : vector<8x2048xf32>
    %4 = tpu.matmul %1, %3, %cst {dimension_numbers = #tpu.dot_dimension_numbers<[1], [0], [0], [1], [0, 0, 1, 1], [], []>} : vector<8x108xf32>, vector<108x2048xf32>, vector<8x2048xf32> -> vector<8x2048xf32>
    %c0_5 = arith.constant 0 : index
    %c0_6 = arith.constant 0 : index
    %c0_7 = arith.constant 0 : index
    %5 = vector.load %arg4[%c0_5, %c0_6, %c0_7] : memref<1x8x1xf32, #tpu.memory_space<vmem>>, vector<1x8x1xf32>
    %6 = vector.shape_cast %5 : vector<1x8x1xf32> to vector<8x1xf32>
    %7 = vector.broadcast %6 : vector<8x1xf32> to vector<8x2048xf32>
    %8 = arith.addf %4, %7 : vector<8x2048xf32>
    %c0_8 = arith.constant 0 : index
    %c0_9 = arith.constant 0 : index
    %c0_10 = arith.constant 0 : index
    %9 = vector.load %arg5[%c0_8, %c0_9, %c0_10] : memref<1x8x2048xf32, #tpu.memory_space<vmem>>, vector<1x8x2048xf32>
    %10 = vector.shape_cast %9 : vector<1x8x2048xf32> to vector<8x2048xf32>
    %11 = vector.shape_cast %8 : vector<8x2048xf32> to vector<1x8x2048xf32>
    tpu.vector_store %arg5[%c0_8, %c0_9, %c0_10], %11 {strides = array<i32>} : memref<1x8x2048xf32, #tpu.memory_space<vmem>>, vector<1x8x2048xf32>,
    %cst_11 = arith.constant dense<0.000000e+00> : vector<8xf32>
    %12 = vector.multi_reduction <add>, %8, %cst_11 [1] : vector<8x2048xf32> to vector<8xf32>
    %13 = vector.shape_cast %12 : vector<8xf32> to vector<8x1xf32>
    %14 = arith.mulf %8, %8 : vector<8x2048xf32>
    %cst_12 = arith.constant dense<0.000000e+00> : vector<8xf32>
    %15 = vector.multi_reduction <add>, %14, %cst_12 [1] : vector<8x2048xf32> to vector<8xf32>
    %16 = vector.shape_cast %15 : vector<8xf32> to vector<8x1xf32>
    %c0_i32 = arith.constant 0 : i32
    %17 = arith.cmpi eq, %arg1, %c0_i32 : i32
    %18 = arith.extui %17 : i1 to i32
    %c0_i32_13 = arith.constant 0 : i32
    %19 = arith.cmpi ne, %18, %c0_i32_13 : i32
    scf.if %19 {
      %c0_16 = arith.constant 0 : index
      %c0_17 = arith.constant 0 : index
      %c0_18 = arith.constant 0 : index
      %23 = vector.load %arg6[%c0_16, %c0_17, %c0_18] : memref<1x8x1xf32, #tpu.memory_space<vmem>>, vector<1x8x1xf32>
      %24 = vector.shape_cast %23 : vector<1x8x1xf32> to vector<8x1xf32>
      %25 = vector.shape_cast %13 : vector<8x1xf32> to vector<1x8x1xf32>
      tpu.vector_store %arg6[%c0_16, %c0_17, %c0_18], %25 {strides = array<i32>} : memref<1x8x1xf32, #tpu.memory_space<vmem>>, vector<1x8x1xf32>,
      %c0_19 = arith.constant 0 : index
      %c0_20 = arith.constant 0 : index
      %c0_21 = arith.constant 0 : index
      %26 = vector.load %arg7[%c0_19, %c0_20, %c0_21] : memref<1x8x1xf32, #tpu.memory_space<vmem>>, vector<1x8x1xf32>
      %27 = vector.shape_cast %26 : vector<1x8x1xf32> to vector<8x1xf32>
      %28 = vector.shape_cast %16 : vector<8x1xf32> to vector<1x8x1xf32>
      tpu.vector_store %arg7[%c0_19, %c0_20, %c0_21], %28 {strides = array<i32>} : memref<1x8x1xf32, #tpu.memory_space<vmem>>, vector<1x8x1xf32>,
    } else {
    }
    %c0_i32_14 = arith.constant 0 : i32
    %20 = arith.cmpi sgt, %arg1, %c0_i32_14 : i32
    %21 = arith.extui %20 : i1 to i32
    %c0_i32_15 = arith.constant 0 : i32
    %22 = arith.cmpi ne, %21, %c0_i32_15 : i32
    scf.if %22 {
      %c0_16 = arith.constant 0 : index
      %c0_17 = arith.constant 0 : index
      %c0_18 = arith.constant 0 : index
      %23 = vector.load %arg6[%c0_16, %c0_17, %c0_18] : memref<1x8x1xf32, #tpu.memory_space<vmem>>, vector<1x8x1xf32>
      %24 = vector.shape_cast %23 : vector<1x8x1xf32> to vector<8x1xf32>
      %25 = arith.addf %24, %13 : vector<8x1xf32>
      %c0_19 = arith.constant 0 : index
      %c0_20 = arith.constant 0 : index
      %c0_21 = arith.constant 0 : index
      %26 = vector.load %arg6[%c0_19, %c0_20, %c0_21] : memref<1x8x1xf32, #tpu.memory_space<vmem>>, vector<1x8x1xf32>
      %27 = vector.shape_cast %26 : vector<1x8x1xf32> to vector<8x1xf32>
      %28 = vector.shape_cast %25 : vector<8x1xf32> to vector<1x8x1xf32>
      tpu.vector_store %arg6[%c0_19, %c0_20, %c0_21], %28 {strides = array<i32>} : memref<1x8x1xf32, #tpu.memory_space<vmem>>, vector<1x8x1xf32>,
      %c0_22 = arith.constant 0 : index
      %c0_23 = arith.constant 0 : index
      %c0_24 = arith.constant 0 : index
      %29 = vector.load %arg7[%c0_22, %c0_23, %c0_24] : memref<1x8x1xf32, #tpu.memory_space<vmem>>, vector<1x8x1xf32>
      %30 = vector.shape_cast %29 : vector<1x8x1xf32> to vector<8x1xf32>
      %31 = arith.addf %30, %16 : vector<8x1xf32>
      %c0_25 = arith.constant 0 : index
      %c0_26 = arith.constant 0 : index
      %c0_27 = arith.constant 0 : index
      %32 = vector.load %arg7[%c0_25, %c0_26, %c0_27] : memref<1x8x1xf32, #tpu.memory_space<vmem>>, vector<1x8x1xf32>
      %33 = vector.shape_cast %32 : vector<1x8x1xf32> to vector<8x1xf32>
      %34 = vector.shape_cast %31 : vector<8x1xf32> to vector<1x8x1xf32>
      tpu.vector_store %arg7[%c0_25, %c0_26, %c0_27], %34 {strides = array<i32>} : memref<1x8x1xf32, #tpu.memory_space<vmem>>, vector<1x8x1xf32>,
    } else {
    }
    return
  }
  func.func @transform_0(%arg0: i32, %arg1: i32) -> (i32, i32, i32) {
    %c0_i32 = arith.constant 0 : i32
    %c0_i32_0 = arith.constant 0 : i32
    return %arg0, %c0_i32, %arg1 : i32, i32, i32
  }
  func.func @transform_1(%arg0: i32, %arg1: i32) -> (i32, i32, i32) {
    %c0_i32 = arith.constant 0 : i32
    %c0_i32_0 = arith.constant 0 : i32
    %c0_i32_1 = arith.constant 0 : i32
    return %arg0, %c0_i32, %c0_i32_0 : i32, i32, i32
  }
  func.func @transform_2(%arg0: i32, %arg1: i32) -> (i32, i32, i32) {
    %c0_i32 = arith.constant 0 : i32
    %c0_i32_0 = arith.constant 0 : i32
    %c0_i32_1 = arith.constant 0 : i32
    return %arg0, %c0_i32, %c0_i32_0 : i32, i32, i32
  }
  func.func @transform_3(%arg0: i32, %arg1: i32) -> (i32, i32, i32) {
    %c0_i32 = arith.constant 0 : i32
    %c0_i32_0 = arith.constant 0 : i32
    return %arg0, %c0_i32, %arg1 : i32, i32, i32
  }
  func.func @transform_4(%arg0: i32, %arg1: i32) -> (i32, i32, i32) {
    %c0_i32 = arith.constant 0 : i32
    %c0_i32_0 = arith.constant 0 : i32
    %c0_i32_1 = arith.constant 0 : i32
    return %arg0, %c0_i32, %c0_i32_0 : i32, i32, i32
  }
  func.func @transform_5(%arg0: i32, %arg1: i32) -> (i32, i32, i32) {
    %c0_i32 = arith.constant 0 : i32
    %c0_i32_0 = arith.constant 0 : i32
    %c0_i32_1 = arith.constant 0 : i32
    return %arg0, %c0_i32, %c0_i32_0 : i32, i32, i32
  }
}

</mosaic_0001>

<bundles_post_ra>
// kernel: tpu_custom_call.1
= control target key start
LH: loop header
LB: loop body
LE: loop exit
PB: predicated region body
PF: predicated region fallthrough
CT: control target
= control target key end

     0   :  { %11 = vsyncpa [#allocation3], 0  ;;  %s2061_s0 = inlined_call_operand.vmem [shape: f32[2,108,2048], index: 0, kind: input, shape index: {}]   ;;  %s2062_s1 = inlined_call_operand.vmem [shape: f32[2,8,108], index: 1, kind: input, shape index: {}]   ;;  %s2063_s2 = inlined_call_operand.vmem [shape: f32[2,8,1], index: 2, kind: input, shape index: {}]   ;;  %s2064_s3 = inlined_call_operand.hbm [shape: f32[2,8,2048], index: 3, kind: output, shape index: {0}]   ;;  %s2065_s4 = inlined_call_operand.vmem [shape: f32[2,8,1], index: 4, kind: output, shape index: {1}]   ;;  %s2066_s5 = inlined_call_operand.vmem [shape: f32[2,8,1], index: 5, kind: output, shape index: {2}]  }
   0x1   :  { %13 = vsyncpa [#allocation3 + $0x1], 0  ;;  %s1635_s18 = smov 0   ;;  %s1637_s19 = smov 0  }
   0x2   :  { %s1639_s20 = smov 0   ;;  %s1641_s21 = smov 0  }
   0x3   :  { %s1643_s22 = smov 0   ;;  %s1645_s23 = smov 0  }
   0x4 LB: > { %s1424_s24 = sadd.s32 4294967295, %s1600_s23   ;;  %s1425_s25 = sadd.s32 4294967294, %s1600_s23   ;;  %s1600_s23 = sphi %s1645_s23, %s19_s23   ;;  %s1596_s22 = sphi %s1643_s22, %s2073_s22   ;;  %s1592_s21 = sphi %s1641_s21, %s2072_s21   ;;  %s1588_s20 = sphi %s1639_s20, %s2071_s20   ;;  %s1584_s19 = sphi %s1637_s19, %s2070_s19   ;;  %s1580_s18 = sphi %s1635_s18, %s2069_s18  }
   0x5   : > { %s31_s26 = sadd.s32 1, %s1596_s22  ;;  %s120_s27 = sadd.s32 1, %s1588_s20 }
   0x6   : > { %p33_p0 = scmp.ge.s32.totalorder %s31_s26, 2  ;;  %p130_p1 = scmp.ne.s32.totalorder %s1588_s20, %s1584_s19 }
   0x7   : > { %p131_p2 = scmp.eq.s32.totalorder %s1424_s24, 1  ;;  %p136_p3 = scmp.ne.s32.totalorder %s1584_s19, %s1580_s18 }
   0x8   : > { %s2075_s26 = smov (%p33_p0, %s31_s26), 0  ;;  %p137_p5 = scmp.eq.s32.totalorder %s1425_s25, 1 }
   0x9   : > { %p1675_p4 = por %p131_p2, %p130_p1  ;;  %s115_s29 = ssub.s32 %s1596_s22, %s2075_s26 }
   0xa   : > { %p1428_p6 = scmp.ge.s32.totalorder %s1600_s23, 1  ;;  %p118_p7 = scmp.eq.s32.totalorder %s115_s29, 0 }
   0xb   : > { %p1682_p8 = por %p137_p5, %p136_p3  ;;  %p234_p9 = scmp.lt.s32.totalorder %s1600_s23, 3 }
   0xc   : > { %s1688_s6 = scalar_select %p118_p7, %s1588_s20, %s120_s27  }
   0xd   : > { %p235_p10 = pnand %p1428_p6, %p234_p9 }
   0xe   : > { %p283_p11 = scmp.lt.s32.totalorder (!%p235_p10), %s1592_s21, 1  ;;  %s267_s25 = sand.u32 (!%p235_p10), 1, %s1584_s19  }
   0xf   : > { %238 = sbr.rel (%p235_p10) target bundleno = 488 (0x1e8), region = 32  ;;  %s1429_s27 = sshll.u32 (!%p235_p10), %s267_s25, 7 }
  0x10   : > { %s1981_s29 = scalar_lea.vmem (!%p235_p10), [#allocation2], %s1429_s27  ;;  %s1246_s13 = scalar_lea.sflag (!%p235_p10), [#allocation3], %s267_s25 }
  0x14   : > { %v1602_v0 = vmov 0.0   ;;  %s284_s7 = scalar_select %p283_p11, %s1592_s21, 1  ;;  %v1603_v1 = vmov 0   ;;  %vm544_vm0 = vcmask 1043456   ;;  %vm540_vm1 = vcmask 883712  }
  0x15   : > { %657 = vmatprep.mubr.f32.mxu0 %v1602_v0  ;;  %728 = vmatprep.mubr.f32.mxu1 %v1602_v0 }
  0x16   : > { %1523 = vset.pattern.permute.xlu0 %v1603_v1  ;;  %s1465_s8 = smul.u32 1792, %s284_s7  ;;  %s1694_s9 = sshll.u32 %s284_s7, 3 }
  0x17   : > { %s299_s12 = scalar_lea.vmem %s2063_s2, %s1694_s9  ;;  %s295_s24 = scalar_lea.vmem %s2062_s1, %s1694_s9 }
  0x18   : > { %s1703_s15 = scalar_lea.vmem %s2061_s0, %s1465_s8  ;;  %v534_v2 = vld [vmem:[%s299_s12] sm:$0xff]  ;;  %s1464_s7 = sshll.u32 %s1592_s21, 11 }
  0x19   : > { %v519_v3 = vld [vmem:[%s1703_s15 + $0x688] sm:$0xf]  ;;  %v521_v4 = vld [vmem:[%s1703_s15 + $0x698] sm:$0xf]  ;;  %v518_v5 = vld [vmem:[%s1703_s15 + $0x680] sm:$0xf]  ;;  %537 = vperm.xlu0 %1523, %v534_v2   ;;  %s1268_s12 = scalar_lea.hbm %s2064_s3, %s1464_s7 }
  0x1a   : > { %1435 = vmatprep.subr.msk.mxu0 %vm544_vm0, %v519_v3  ;;  %1438 = vmatprep.subr.msk.mxu1 %vm544_vm0, %v521_v4  ;;  %v520_v6 = vld [vmem:[%s1703_s15 + $0x690] sm:$0xf]  ;;  %v503_v7 = vld [vmem:[%s1703_s15 + $0x608] sm:$0xff]  ;;  %v505_v8 = vld [vmem:[%s1703_s15 + $0x618] sm:$0xff]  ;;  %s1270_s8 = sshll.u32 %s1981_s29, 4  ;;  %s1271_s8 = int_to_ptr.vmem [resolvable:$true] %s1270_s8 }
  0x1b   : > { %1436 = vmatpush1.msk.msra.mxu0 %vm544_vm0, %v518_v5  ;;  %1439 = vmatpush1.msk.msra.mxu1 %vm544_vm0, %v520_v6  ;;  %v502_v9 = vld [vmem:[%s1703_s15 + $0x600] sm:$0xff]  ;;  %v504_v10 = vld [vmem:[%s1703_s15 + $0x610] sm:$0xff]  ;;  %v487_v11 = vld [vmem:[%s1703_s15 + $0x588] sm:$0xff]  ;;  %s1524_s14 = scalar_lea.vmem %s1271_s8, 2048 }
  0x1c   : > { %599 = vmatprep.subr.mxu0 %v503_v7  ;;  %670 = vmatprep.subr.mxu1 %v505_v8  ;;  %v489_v12 = vld [vmem:[%s1703_s15 + $0x598] sm:$0xff]  ;;  %v486_v13 = vld [vmem:[%s1703_s15 + $0x580] sm:$0xff]  ;;  %v488_v14 = vld [vmem:[%s1703_s15 + $0x590] sm:$0xff]  ;;  %p1525_p12 = scmp.ne.s32.totalorder %s1271_s8, %s1524_s14 }
  0x1d   : > { %600 = vmatpush1.msra.mxu0 %v502_v9  ;;  %671 = vmatpush1.msra.mxu1 %v504_v10  ;;  %v471_v15 = vld [vmem:[%s1703_s15 + $0x508] sm:$0xff]  ;;  %v473_v16 = vld [vmem:[%s1703_s15 + $0x518] sm:$0xff]  ;;  %v470_v17 = vld [vmem:[%s1703_s15 + $0x500] sm:$0xff] }
  0x1e   : > { %601 = vmatprep.subr.mxu0 %v487_v11  ;;  %672 = vmatprep.subr.mxu1 %v489_v12  ;;  %v472_v18 = vld [vmem:[%s1703_s15 + $0x510] sm:$0xff]  ;;  %v455_v19 = vld [vmem:[%s1703_s15 + $0x488] sm:$0xff]  ;;  %v457_v20 = vld [vmem:[%s1703_s15 + $0x498] sm:$0xff]  ;;  %p1526_p13 = pnand %p1525_p12, %p1675_p4 }
  0x1f   : > { %602 = vmatpush1.msra.mxu0 %v486_v13  ;;  %673 = vmatpush1.msra.mxu1 %v488_v14  ;;  %v454_v21 = vld [vmem:[%s1703_s15 + $0x480] sm:$0xff]  ;;  %v456_v22 = vld [vmem:[%s1703_s15 + $0x490] sm:$0xff]  ;;  %v439_v23 = vld [vmem:[%s1703_s15 + $0x408] sm:$0xff] }
  0x20   : > { %603 = vmatprep.subr.mxu0 %v471_v15  ;;  %674 = vmatprep.subr.mxu1 %v473_v16  ;;  %v441_v24 = vld [vmem:[%s1703_s15 + $0x418] sm:$0xff]  ;;  %v438_v25 = vld [vmem:[%s1703_s15 + $0x400] sm:$0xff]  ;;  %v440_v26 = vld [vmem:[%s1703_s15 + $0x410] sm:$0xff]  ;;  %p1527_p0 = pneg %p1526_p13 }
  0x21   : > { %604 = vmatpush1.msra.mxu0 %v470_v17  ;;  %675 = vmatpush1.msra.mxu1 %v472_v18  ;;  %v423_v27 = vld [vmem:[%s1703_s15 + $0x388] sm:$0xff]  ;;  %v425_v28 = vld [vmem:[%s1703_s15 + $0x398] sm:$0xff]  ;;  %v422_v29 = vld [vmem:[%s1703_s15 + $0x380] sm:$0xff] }
  0x22   : > { %605 = vmatprep.subr.mxu0 %v455_v19  ;;  %676 = vmatprep.subr.mxu1 %v457_v20  ;;  %v424_v30 = vld [vmem:[%s1703_s15 + $0x390] sm:$0xff]  ;;  %v407_v31 = vld [vmem:[%s1703_s15 + $0x308] sm:$0xff]  ;;  %v409_v32 = vld [vmem:[%s1703_s15 + $0x318] sm:$0xff] }
  0x23   : > { %606 = vmatpush1.msra.mxu0 %v454_v21  ;;  %677 = vmatpush1.msra.mxu1 %v456_v22  ;;  %v406_v33 = vld [vmem:[%s1703_s15 + $0x300] sm:$0xff]  ;;  %v408_v34 = vld [vmem:[%s1703_s15 + $0x310] sm:$0xff]  ;;  %v391_v35 = vld [vmem:[%s1703_s15 + $0x288] sm:$0xff] }
  0x24   : > { %607 = vmatprep.subr.mxu0 %v439_v23  ;;  %678 = vmatprep.subr.mxu1 %v441_v24  ;;  %v393_v36 = vld [vmem:[%s1703_s15 + $0x298] sm:$0xff]  ;;  %v390_v37 = vld [vmem:[%s1703_s15 + $0x280] sm:$0xff]  ;;  %v392_v38 = vld [vmem:[%s1703_s15 + $0x290] sm:$0xff] }
  0x25   : > { %608 = vmatpush1.msra.mxu0 %v438_v25  ;;  %679 = vmatpush1.msra.mxu1 %v440_v26  ;;  %v375_v39 = vld [vmem:[%s1703_s15 + $0x208] sm:$0xff]  ;;  %v377_v40 = vld [vmem:[%s1703_s15 + $0x218] sm:$0xff]  ;;  %v374_v41 = vld [vmem:[%s1703_s15 + $0x200] sm:$0xff] }
  0x26   : > { %609 = vmatprep.subr.mxu0 %v423_v27  ;;  %680 = vmatprep.subr.mxu1 %v425_v28  ;;  %v376_v42 = vld [vmem:[%s1703_s15 + $0x210] sm:$0xff]  ;;  %v359_v43 = vld [vmem:[%s1703_s15 + $0x188] sm:$0xff]  ;;  %v361_v44 = vld [vmem:[%s1703_s15 + $0x198] sm:$0xff] }
  0x27   : > { %610 = vmatpush1.msra.mxu0 %v422_v29  ;;  %681 = vmatpush1.msra.mxu1 %v424_v30  ;;  %v358_v45 = vld [vmem:[%s1703_s15 + $0x180] sm:$0xff]  ;;  %v360_v46 = vld [vmem:[%s1703_s15 + $0x190] sm:$0xff]  ;;  %v343_v47 = vld [vmem:[%s1703_s15 + $0x108] sm:$0xff] }
  0x28   : > { %611 = vmatprep.subr.mxu0 %v407_v31  ;;  %682 = vmatprep.subr.mxu1 %v409_v32  ;;  %v345_v48 = vld [vmem:[%s1703_s15 + $0x118] sm:$0xff]  ;;  %v342_v49 = vld [vmem:[%s1703_s15 + $0x100] sm:$0xff]  ;;  %v344_v50 = vld [vmem:[%s1703_s15 + $0x110] sm:$0xff] }
  0x29   : > { %612 = vmatpush1.msra.mxu0 %v406_v33  ;;  %683 = vmatpush1.msra.mxu1 %v408_v34  ;;  %v327_v51 = vld [vmem:[%s1703_s15 + $0x88] sm:$0xff]  ;;  %v329_v52 = vld [vmem:[%s1703_s15 + $0x98] sm:$0xff]  ;;  %v326_v53 = vld [vmem:[%s1703_s15 + $0x80] sm:$0xff] }
  0x2a   : > { %613 = vmatprep.subr.mxu0 %v391_v35  ;;  %684 = vmatprep.subr.mxu1 %v393_v36  ;;  %v328_v54 = vld [vmem:[%s1703_s15 + $0x90] sm:$0xff]  ;;  %v311_v55 = vld [vmem:[%s1703_s15 + $0x8] sm:$0xff]  ;;  %v313_v56 = vld [vmem:[%s1703_s15 + $0x18] sm:$0xff] }
  0x2b   : > { %614 = vmatpush1.msra.mxu0 %v390_v37  ;;  %685 = vmatpush1.msra.mxu1 %v392_v38  ;;  %v310_v57 = vld [vmem:[%s1703_s15] sm:$0xff]  ;;  %v312_v58 = vld [vmem:[%s1703_s15 + $0x10] sm:$0xff]  ;;  %v523_v60 = vld [vmem:[%s1703_s15 + $0x6a8] sm:$0xf] }
  0x2c   : > { %615 = vmatprep.subr.mxu0 %v375_v39  ;;  %686 = vmatprep.subr.mxu1 %v377_v40  ;;  %v1769_v59 = vld [vmem:[%s295_s24] sm:$0xff]  ;;  %v525_v61 = vld [vmem:[%s1703_s15 + $0x6b8] sm:$0xf]  ;;  %v524_v63 = vld [vmem:[%s1703_s15 + $0x6b0] sm:$0xf] }
  0x2d   : > { %616 = vmatpush1.msra.mxu0 %v374_v41  ;;  %687 = vmatpush1.msra.mxu1 %v376_v42  ;;  %v522_v62 = vld [vmem:[%s1703_s15 + $0x6a0] sm:$0xf]  ;;  %v507_v1 = vld [vmem:[%s1703_s15 + $0x628] sm:$0xff]  ;;  %v509_v2 = vld [vmem:[%s1703_s15 + $0x638] sm:$0xff] }
  0x2e   : > { %617 = vmatprep.subr.mxu0 %v359_v43  ;;  %688 = vmatprep.subr.mxu1 %v361_v44  ;;  %v506_v3 = vld [vmem:[%s1703_s15 + $0x620] sm:$0xff]  ;;  %v508_v4 = vld [vmem:[%s1703_s15 + $0x630] sm:$0xff]  ;;  %v491_v5 = vld [vmem:[%s1703_s15 + $0x5a8] sm:$0xff] }
  0x2f   : > { %618 = vmatpush1.msra.mxu0 %v358_v45  ;;  %689 = vmatpush1.msra.mxu1 %v360_v46  ;;  %v493_v6 = vld [vmem:[%s1703_s15 + $0x5b8] sm:$0xff]  ;;  %v490_v7 = vld [vmem:[%s1703_s15 + $0x5a0] sm:$0xff]  ;;  %v492_v8 = vld [vmem:[%s1703_s15 + $0x5b0] sm:$0xff] }
  0x30   : > { %619 = vmatprep.subr.mxu0 %v343_v47  ;;  %690 = vmatprep.subr.mxu1 %v345_v48  ;;  %v475_v9 = vld [vmem:[%s1703_s15 + $0x528] sm:$0xff]  ;;  %v477_v10 = vld [vmem:[%s1703_s15 + $0x538] sm:$0xff]  ;;  %v474_v11 = vld [vmem:[%s1703_s15 + $0x520] sm:$0xff] }
  0x31   : > { %620 = vmatpush1.msra.mxu0 %v342_v49  ;;  %691 = vmatpush1.msra.mxu1 %v344_v50  ;;  %v476_v12 = vld [vmem:[%s1703_s15 + $0x530] sm:$0xff]  ;;  %v459_v13 = vld [vmem:[%s1703_s15 + $0x4a8] sm:$0xff]  ;;  %v461_v14 = vld [vmem:[%s1703_s15 + $0x4b8] sm:$0xff] }
  0x32   : > { %621 = vmatprep.subr.mxu0 %v327_v51  ;;  %692 = vmatprep.subr.mxu1 %v329_v52  ;;  %v458_v15 = vld [vmem:[%s1703_s15 + $0x4a0] sm:$0xff]  ;;  %v460_v16 = vld [vmem:[%s1703_s15 + $0x4b0] sm:$0xff]  ;;  %v443_v17 = vld [vmem:[%s1703_s15 + $0x428] sm:$0xff] }
  0x33   : > { %622 = vmatpush1.msra.mxu0 %v326_v53  ;;  %693 = vmatpush1.msra.mxu1 %v328_v54  ;;  %v445_v18 = vld [vmem:[%s1703_s15 + $0x438] sm:$0xff]  ;;  %v442_v19 = vld [vmem:[%s1703_s15 + $0x420] sm:$0xff]  ;;  %v444_v20 = vld [vmem:[%s1703_s15 + $0x430] sm:$0xff] }
  0x34   : > { %623 = vmatprep.subr.mxu0 %v311_v55  ;;  %694 = vmatprep.subr.mxu1 %v313_v56  ;;  %v427_v21 = vld [vmem:[%s1703_s15 + $0x3a8] sm:$0xff]  ;;  %v429_v22 = vld [vmem:[%s1703_s15 + $0x3b8] sm:$0xff]  ;;  %v426_v23 = vld [vmem:[%s1703_s15 + $0x3a0] sm:$0xff] }
  0x35   : > { %624 = vmatpush1.msra.mxu0 %v310_v57  ;;  %695 = vmatpush1.msra.mxu1 %v312_v58  ;;  %v428_v24 = vld [vmem:[%s1703_s15 + $0x3b0] sm:$0xff]  ;;  %v411_v25 = vld [vmem:[%s1703_s15 + $0x328] sm:$0xff]  ;;  %v413_v26 = vld [vmem:[%s1703_s15 + $0x338] sm:$0xff] }
  0x36   : > { %1437 = vmatmul.mubr.msk.f32.vlgmr.msra.gmra.mxu0 %vm540_vm1, %v1769_v59  ;;  %1441 = vmatprep.subr.msk.mxu0 %vm544_vm0, %v523_v60  ;;  %v410_v27 = vld [vmem:[%s1703_s15 + $0x320] sm:$0xff]  ;;  %v412_v28 = vld [vmem:[%s1703_s15 + $0x330] sm:$0xff]  ;;  %v395_v29 = vld [vmem:[%s1703_s15 + $0x2a8] sm:$0xff] }
  0x37   : > { %1444 = vmatprep.subr.msk.mxu1 %vm544_vm0, %v525_v61  ;;  %1440 = vmatmul.mubr.msk.f32.vlgmr.msra.gmra.mxu1 %vm540_vm1, %v1769_v59  ;;  %v397_v30 = vld [vmem:[%s1703_s15 + $0x2b8] sm:$0xff]  ;;  %v394_v31 = vld [vmem:[%s1703_s15 + $0x2a0] sm:$0xff]  ;;  %v396_v32 = vld [vmem:[%s1703_s15 + $0x2b0] sm:$0xff] }
  0x38   : > { %1442 = vmatpush1.msk.msra.mxu0 %vm544_vm0, %v522_v62  ;;  %1445 = vmatpush1.msk.msra.mxu1 %vm544_vm0, %v524_v63  ;;  %v379_v33 = vld [vmem:[%s1703_s15 + $0x228] sm:$0xff]  ;;  %v381_v34 = vld [vmem:[%s1703_s15 + $0x238] sm:$0xff]  ;;  %v378_v35 = vld [vmem:[%s1703_s15 + $0x220] sm:$0xff] }
  0x39   : > { %741 = vmatprep.subr.mxu0 %v507_v1  ;;  %812 = vmatprep.subr.mxu1 %v509_v2  ;;  %v380_v36 = vld [vmem:[%s1703_s15 + $0x230] sm:$0xff]  ;;  %v363_v37 = vld [vmem:[%s1703_s15 + $0x1a8] sm:$0xff]  ;;  %v365_v38 = vld [vmem:[%s1703_s15 + $0x1b8] sm:$0xff] }
  0x3a   : > { %742 = vmatpush1.msra.mxu0 %v506_v3  ;;  %813 = vmatpush1.msra.mxu1 %v508_v4  ;;  %v362_v39 = vld [vmem:[%s1703_s15 + $0x1a0] sm:$0xff]  ;;  %v364_v40 = vld [vmem:[%s1703_s15 + $0x1b0] sm:$0xff]  ;;  %v347_v41 = vld [vmem:[%s1703_s15 + $0x128] sm:$0xff] }
  0x3b   : > { %743 = vmatprep.subr.mxu0 %v491_v5  ;;  %814 = vmatprep.subr.mxu1 %v493_v6  ;;  %v349_v42 = vld [vmem:[%s1703_s15 + $0x138] sm:$0xff]  ;;  %v346_v43 = vld [vmem:[%s1703_s15 + $0x120] sm:$0xff]  ;;  %v348_v44 = vld [vmem:[%s1703_s15 + $0x130] sm:$0xff] }
  0x3c   : > { %744 = vmatpush1.msra.mxu0 %v490_v7  ;;  %815 = vmatpush1.msra.mxu1 %v492_v8  ;;  %v331_v45 = vld [vmem:[%s1703_s15 + $0xa8] sm:$0xff]  ;;  %v333_v46 = vld [vmem:[%s1703_s15 + $0xb8] sm:$0xff]  ;;  %v330_v47 = vld [vmem:[%s1703_s15 + $0xa0] sm:$0xff] }
  0x3d   : > { %745 = vmatprep.subr.mxu0 %v475_v9  ;;  %816 = vmatprep.subr.mxu1 %v477_v10  ;;  %v332_v48 = vld [vmem:[%s1703_s15 + $0xb0] sm:$0xff]  ;;  %v315_v49 = vld [vmem:[%s1703_s15 + $0x28] sm:$0xff]  ;;  %v317_v50 = vld [vmem:[%s1703_s15 + $0x38] sm:$0xff] }
  0x3e   : > { %746 = vmatpush1.msra.mxu0 %v474_v11  ;;  %817 = vmatpush1.msra.mxu1 %v476_v12  ;;  %v314_v51 = vld [vmem:[%s1703_s15 + $0x20] sm:$0xff]  ;;  %v316_v52 = vld [vmem:[%s1703_s15 + $0x30] sm:$0xff]  ;;  %v527_v53 = vld [vmem:[%s1703_s15 + $0x6c8] sm:$0xf] }
  0x3f   : > { %747 = vmatprep.subr.mxu0 %v459_v13  ;;  %818 = vmatprep.subr.mxu1 %v461_v14  ;;  %v529_v54 = vld [vmem:[%s1703_s15 + $0x6d8] sm:$0xf]  ;;  %v526_v55 = vld [vmem:[%s1703_s15 + $0x6c0] sm:$0xf]  ;;  %v528_v56 = vld [vmem:[%s1703_s15 + $0x6d0] sm:$0xf] }
  0x40   : > { %748 = vmatpush1.msra.mxu0 %v458_v15  ;;  %819 = vmatpush1.msra.mxu1 %v460_v16  ;;  %v511_v57 = vld [vmem:[%s1703_s15 + $0x648] sm:$0xff]  ;;  %v513_v58 = vld [vmem:[%s1703_s15 + $0x658] sm:$0xff]  ;;  %v510_v60 = vld [vmem:[%s1703_s15 + $0x640] sm:$0xff] }
  0x41   : > { %749 = vmatprep.subr.mxu0 %v443_v17  ;;  %820 = vmatprep.subr.mxu1 %v445_v18  ;;  %v512_v61 = vld [vmem:[%s1703_s15 + $0x650] sm:$0xff]  ;;  %v495_v62 = vld [vmem:[%s1703_s15 + $0x5c8] sm:$0xff]  ;;  %v497_v63 = vld [vmem:[%s1703_s15 + $0x5d8] sm:$0xff] }
  0x42   : > { %750 = vmatpush1.msra.mxu0 %v442_v19  ;;  %821 = vmatpush1.msra.mxu1 %v444_v20  ;;  %v494_v1 = vld [vmem:[%s1703_s15 + $0x5c0] sm:$0xff]  ;;  %v496_v2 = vld [vmem:[%s1703_s15 + $0x5d0] sm:$0xff]  ;;  %v479_v3 = vld [vmem:[%s1703_s15 + $0x548] sm:$0xff] }
  0x43   : > { %751 = vmatprep.subr.mxu0 %v427_v21  ;;  %822 = vmatprep.subr.mxu1 %v429_v22  ;;  %v481_v4 = vld [vmem:[%s1703_s15 + $0x558] sm:$0xff]  ;;  %v478_v5 = vld [vmem:[%s1703_s15 + $0x540] sm:$0xff]  ;;  %v480_v6 = vld [vmem:[%s1703_s15 + $0x550] sm:$0xff] }
  0x44   : > { %752 = vmatpush1.msra.mxu0 %v426_v23  ;;  %823 = vmatpush1.msra.mxu1 %v428_v24  ;;  %v463_v7 = vld [vmem:[%s1703_s15 + $0x4c8] sm:$0xff]  ;;  %v465_v8 = vld [vmem:[%s1703_s15 + $0x4d8] sm:$0xff]  ;;  %v462_v9 = vld [vmem:[%s1703_s15 + $0x4c0] sm:$0xff] }
  0x45   : > { %753 = vmatprep.subr.mxu0 %v411_v25  ;;  %824 = vmatprep.subr.mxu1 %v413_v26  ;;  %v464_v10 = vld [vmem:[%s1703_s15 + $0x4d0] sm:$0xff]  ;;  %v447_v11 = vld [vmem:[%s1703_s15 + $0x448] sm:$0xff]  ;;  %v449_v12 = vld [vmem:[%s1703_s15 + $0x458] sm:$0xff] }
  0x46   : > { %754 = vmatpush1.msra.mxu0 %v410_v27  ;;  %825 = vmatpush1.msra.mxu1 %v412_v28  ;;  %v446_v13 = vld [vmem:[%s1703_s15 + $0x440] sm:$0xff]  ;;  %v448_v14 = vld [vmem:[%s1703_s15 + $0x450] sm:$0xff]  ;;  %v431_v15 = vld [vmem:[%s1703_s15 + $0x3c8] sm:$0xff] }
  0x47   : > { %755 = vmatprep.subr.mxu0 %v395_v29  ;;  %826 = vmatprep.subr.mxu1 %v397_v30  ;;  %v433_v16 = vld [vmem:[%s1703_s15 + $0x3d8] sm:$0xff]  ;;  %v430_v17 = vld [vmem:[%s1703_s15 + $0x3c0] sm:$0xff]  ;;  %v432_v18 = vld [vmem:[%s1703_s15 + $0x3d0] sm:$0xff] }
  0x48   : > { %756 = vmatpush1.msra.mxu0 %v394_v31  ;;  %827 = vmatpush1.msra.mxu1 %v396_v32  ;;  %v415_v19 = vld [vmem:[%s1703_s15 + $0x348] sm:$0xff]  ;;  %v417_v20 = vld [vmem:[%s1703_s15 + $0x358] sm:$0xff]  ;;  %v414_v21 = vld [vmem:[%s1703_s15 + $0x340] sm:$0xff] }
  0x49   : > { %757 = vmatprep.subr.mxu0 %v379_v33  ;;  %828 = vmatprep.subr.mxu1 %v381_v34  ;;  %v416_v22 = vld [vmem:[%s1703_s15 + $0x350] sm:$0xff]  ;;  %v399_v23 = vld [vmem:[%s1703_s15 + $0x2c8] sm:$0xff]  ;;  %v401_v24 = vld [vmem:[%s1703_s15 + $0x2d8] sm:$0xff] }
  0x4a   : > { %758 = vmatpush1.msra.mxu0 %v378_v35  ;;  %829 = vmatpush1.msra.mxu1 %v380_v36  ;;  %v398_v25 = vld [vmem:[%s1703_s15 + $0x2c0] sm:$0xff]  ;;  %v400_v26 = vld [vmem:[%s1703_s15 + $0x2d0] sm:$0xff]  ;;  %v383_v27 = vld [vmem:[%s1703_s15 + $0x248] sm:$0xff] }
  0x4b   : > { %759 = vmatprep.subr.mxu0 %v363_v37  ;;  %830 = vmatprep.subr.mxu1 %v365_v38  ;;  %v385_v28 = vld [vmem:[%s1703_s15 + $0x258] sm:$0xff]  ;;  %v382_v29 = vld [vmem:[%s1703_s15 + $0x240] sm:$0xff]  ;;  %v384_v30 = vld [vmem:[%s1703_s15 + $0x250] sm:$0xff] }
  0x4c   : > { %760 = vmatpush1.msra.mxu0 %v362_v39  ;;  %831 = vmatpush1.msra.mxu1 %v364_v40  ;;  %v367_v31 = vld [vmem:[%s1703_s15 + $0x1c8] sm:$0xff]  ;;  %v369_v32 = vld [vmem:[%s1703_s15 + $0x1d8] sm:$0xff]  ;;  %v366_v33 = vld [vmem:[%s1703_s15 + $0x1c0] sm:$0xff] }
  0x4d   : > { %761 = vmatprep.subr.mxu0 %v347_v41  ;;  %832 = vmatprep.subr.mxu1 %v349_v42  ;;  %v368_v34 = vld [vmem:[%s1703_s15 + $0x1d0] sm:$0xff]  ;;  %v351_v35 = vld [vmem:[%s1703_s15 + $0x148] sm:$0xff]  ;;  %v353_v36 = vld [vmem:[%s1703_s15 + $0x158] sm:$0xff] }
  0x4e   : > { %762 = vmatpush1.msra.mxu0 %v346_v43  ;;  %833 = vmatpush1.msra.mxu1 %v348_v44  ;;  %v350_v37 = vld [vmem:[%s1703_s15 + $0x140] sm:$0xff]  ;;  %v352_v38 = vld [vmem:[%s1703_s15 + $0x150] sm:$0xff]  ;;  %v335_v39 = vld [vmem:[%s1703_s15 + $0xc8] sm:$0xff] }
  0x4f   : > { %763 = vmatprep.subr.mxu0 %v331_v45  ;;  %834 = vmatprep.subr.mxu1 %v333_v46  ;;  %v337_v40 = vld [vmem:[%s1703_s15 + $0xd8] sm:$0xff]  ;;  %v334_v41 = vld [vmem:[%s1703_s15 + $0xc0] sm:$0xff]  ;;  %v336_v42 = vld [vmem:[%s1703_s15 + $0xd0] sm:$0xff] }
  0x50   : > { %764 = vmatpush1.msra.mxu0 %v330_v47  ;;  %835 = vmatpush1.msra.mxu1 %v332_v48  ;;  %v319_v43 = vld [vmem:[%s1703_s15 + $0x48] sm:$0xff]  ;;  %v321_v44 = vld [vmem:[%s1703_s15 + $0x58] sm:$0xff]  ;;  %v318_v45 = vld [vmem:[%s1703_s15 + $0x40] sm:$0xff] }
  0x51   : > { %765 = vmatprep.subr.mxu0 %v315_v49  ;;  %836 = vmatprep.subr.mxu1 %v317_v50  ;;  %v320_v46 = vld [vmem:[%s1703_s15 + $0x50] sm:$0xff]  ;;  %v531_v47 = vld [vmem:[%s1703_s15 + $0x6e8] sm:$0xf]  ;;  %v533_v48 = vld [vmem:[%s1703_s15 + $0x6f8] sm:$0xf] }
  0x52   : > { %766 = vmatpush1.msra.mxu0 %v314_v51  ;;  %799 = vmatprep.mubr.f32.mxu0 %v1602_v0  ;;  %v530_v49 = vld [vmem:[%s1703_s15 + $0x6e0] sm:$0xf]  ;;  %v532_v50 = vld [vmem:[%s1703_s15 + $0x6f0] sm:$0xf]  ;;  %v515_v51 = vld [vmem:[%s1703_s15 + $0x668] sm:$0xff] }
  0x53   : > { %837 = vmatpush1.msra.mxu1 %v316_v52  ;;  %1443 = vmatmul.mubr.msk.f32.vlgmr.msra.gmra.mxu0 %vm540_vm1, %v1769_v59  ;;  %v517_v52 = vld [vmem:[%s1703_s15 + $0x678] sm:$0xff] }
  0x54   : > { %870 = vmatprep.mubr.f32.mxu1 %v1602_v0  ;;  %1447 = vmatprep.subr.msk.mxu0 %vm544_vm0, %v527_v53  ;;  %v514_v53 = vld [vmem:[%s1703_s15 + $0x660] sm:$0xff] }
  0x55   : > { %1450 = vmatprep.subr.msk.mxu1 %vm544_vm0, %v529_v54  ;;  %1446 = vmatmul.mubr.msk.f32.vlgmr.msra.gmra.mxu1 %vm540_vm1, %v1769_v59  ;;  %v516_v54 = vld [vmem:[%s1703_s15 + $0x670] sm:$0xff] }
  0x56   : > { %1448 = vmatpush1.msk.msra.mxu0 %vm544_vm0, %v526_v55  ;;  %1451 = vmatpush1.msk.msra.mxu1 %vm544_vm0, %v528_v56  ;;  %v499_v55 = vld [vmem:[%s1703_s15 + $0x5e8] sm:$0xff]  ;;  %v501_v56 = vld [vmem:[%s1703_s15 + $0x5f8] sm:$0xff] }
  0x57   : > { %883 = vmatprep.subr.mxu0 %v511_v57  ;;  %954 = vmatprep.subr.mxu1 %v513_v58  ;;  %v498_v57 = vld [vmem:[%s1703_s15 + $0x5e0] sm:$0xff]  ;;  %v500_v58 = vld [vmem:[%s1703_s15 + $0x5f0] sm:$0xff] }
  0x58   : > { %884 = vmatpush1.msra.mxu0 %v510_v60  ;;  %955 = vmatpush1.msra.mxu1 %v512_v61  ;;  %v483_v60 = vld [vmem:[%s1703_s15 + $0x568] sm:$0xff]  ;;  %v485_v61 = vld [vmem:[%s1703_s15 + $0x578] sm:$0xff] }
  0x59   : > { %885 = vmatprep.subr.mxu0 %v495_v62  ;;  %956 = vmatprep.subr.mxu1 %v497_v63  ;;  %v482_v62 = vld [vmem:[%s1703_s15 + $0x560] sm:$0xff]  ;;  %v484_v63 = vld [vmem:[%s1703_s15 + $0x570] sm:$0xff] }
  0x5a   : > { %886 = vmatpush1.msra.mxu0 %v494_v1  ;;  %957 = vmatpush1.msra.mxu1 %v496_v2  ;;  %v467_v1 = vld [vmem:[%s1703_s15 + $0x4e8] sm:$0xff]  ;;  %v469_v2 = vld [vmem:[%s1703_s15 + $0x4f8] sm:$0xff] }
  0x5b   : > { %887 = vmatprep.subr.mxu0 %v479_v3  ;;  %958 = vmatprep.subr.mxu1 %v481_v4  ;;  %v466_v3 = vld [vmem:[%s1703_s15 + $0x4e0] sm:$0xff]  ;;  %v468_v4 = vld [vmem:[%s1703_s15 + $0x4f0] sm:$0xff] }
  0x5c   : > { %888 = vmatpush1.msra.mxu0 %v478_v5  ;;  %959 = vmatpush1.msra.mxu1 %v480_v6  ;;  %v451_v5 = vld [vmem:[%s1703_s15 + $0x468] sm:$0xff]  ;;  %v453_v6 = vld [vmem:[%s1703_s15 + $0x478] sm:$0xff] }
  0x5d   : > { %889 = vmatprep.subr.mxu0 %v463_v7  ;;  %960 = vmatprep.subr.mxu1 %v465_v8  ;;  %v450_v7 = vld [vmem:[%s1703_s15 + $0x460] sm:$0xff]  ;;  %v452_v8 = vld [vmem:[%s1703_s15 + $0x470] sm:$0xff] }
  0x5e   : > { %890 = vmatpush1.msra.mxu0 %v462_v9  ;;  %961 = vmatpush1.msra.mxu1 %v464_v10  ;;  %v435_v9 = vld [vmem:[%s1703_s15 + $0x3e8] sm:$0xff]  ;;  %v437_v10 = vld [vmem:[%s1703_s15 + $0x3f8] sm:$0xff] }
  0x5f   : > { %891 = vmatprep.subr.mxu0 %v447_v11  ;;  %962 = vmatprep.subr.mxu1 %v449_v12  ;;  %v434_v11 = vld [vmem:[%s1703_s15 + $0x3e0] sm:$0xff]  ;;  %v436_v12 = vld [vmem:[%s1703_s15 + $0x3f0] sm:$0xff] }
  0x60   : > { %892 = vmatpush1.msra.mxu0 %v446_v13  ;;  %963 = vmatpush1.msra.mxu1 %v448_v14  ;;  %v419_v13 = vld [vmem:[%s1703_s15 + $0x368] sm:$0xff]  ;;  %v421_v14 = vld [vmem:[%s1703_s15 + $0x378] sm:$0xff] }
  0x61   : > { %893 = vmatprep.subr.mxu0 %v431_v15  ;;  %964 = vmatprep.subr.mxu1 %v433_v16  ;;  %v418_v15 = vld [vmem:[%s1703_s15 + $0x360] sm:$0xff]  ;;  %v420_v16 = vld [vmem:[%s1703_s15 + $0x370] sm:$0xff] }
  0x62   : > { %894 = vmatpush1.msra.mxu0 %v430_v17  ;;  %965 = vmatpush1.msra.mxu1 %v432_v18  ;;  %v403_v17 = vld [vmem:[%s1703_s15 + $0x2e8] sm:$0xff]  ;;  %v405_v18 = vld [vmem:[%s1703_s15 + $0x2f8] sm:$0xff] }
  0x63   : > { %895 = vmatprep.subr.mxu0 %v415_v19  ;;  %966 = vmatprep.subr.mxu1 %v417_v20  ;;  %v402_v19 = vld [vmem:[%s1703_s15 + $0x2e0] sm:$0xff]  ;;  %v404_v20 = vld [vmem:[%s1703_s15 + $0x2f0] sm:$0xff] }
  0x64   : > { %896 = vmatpush1.msra.mxu0 %v414_v21  ;;  %967 = vmatpush1.msra.mxu1 %v416_v22  ;;  %v387_v21 = vld [vmem:[%s1703_s15 + $0x268] sm:$0xff]  ;;  %v389_v22 = vld [vmem:[%s1703_s15 + $0x278] sm:$0xff] }
  0x65   : > { %897 = vmatprep.subr.mxu0 %v399_v23  ;;  %968 = vmatprep.subr.mxu1 %v401_v24  ;;  %v386_v23 = vld [vmem:[%s1703_s15 + $0x260] sm:$0xff]  ;;  %v388_v24 = vld [vmem:[%s1703_s15 + $0x270] sm:$0xff] }
  0x66   : > { %898 = vmatpush1.msra.mxu0 %v398_v25  ;;  %969 = vmatpush1.msra.mxu1 %v400_v26  ;;  %v371_v25 = vld [vmem:[%s1703_s15 + $0x1e8] sm:$0xff]  ;;  %v373_v26 = vld [vmem:[%s1703_s15 + $0x1f8] sm:$0xff] }
  0x67   : > { %899 = vmatprep.subr.mxu0 %v383_v27  ;;  %970 = vmatprep.subr.mxu1 %v385_v28  ;;  %v370_v27 = vld [vmem:[%s1703_s15 + $0x1e0] sm:$0xff]  ;;  %v372_v28 = vld [vmem:[%s1703_s15 + $0x1f0] sm:$0xff] }
  0x68   : > { %900 = vmatpush1.msra.mxu0 %v382_v29  ;;  %971 = vmatpush1.msra.mxu1 %v384_v30  ;;  %v355_v29 = vld [vmem:[%s1703_s15 + $0x168] sm:$0xff]  ;;  %v357_v30 = vld [vmem:[%s1703_s15 + $0x178] sm:$0xff] }
  0x69   : > { %901 = vmatprep.subr.mxu0 %v367_v31  ;;  %972 = vmatprep.subr.mxu1 %v369_v32  ;;  %v354_v31 = vld [vmem:[%s1703_s15 + $0x160] sm:$0xff]  ;;  %v356_v32 = vld [vmem:[%s1703_s15 + $0x170] sm:$0xff] }
  0x6a   : > { %902 = vmatpush1.msra.mxu0 %v366_v33  ;;  %973 = vmatpush1.msra.mxu1 %v368_v34  ;;  %v339_v33 = vld [vmem:[%s1703_s15 + $0xe8] sm:$0xff]  ;;  %v341_v34 = vld [vmem:[%s1703_s15 + $0xf8] sm:$0xff] }
  0x6b   : > { %903 = vmatprep.subr.mxu0 %v351_v35  ;;  %974 = vmatprep.subr.mxu1 %v353_v36  ;;  %v338_v35 = vld [vmem:[%s1703_s15 + $0xe0] sm:$0xff]  ;;  %v340_v36 = vld [vmem:[%s1703_s15 + $0xf0] sm:$0xff] }
  0x6c   : > { %904 = vmatpush1.msra.mxu0 %v350_v37  ;;  %975 = vmatpush1.msra.mxu1 %v352_v38  ;;  %v323_v37 = vld [vmem:[%s1703_s15 + $0x68] sm:$0xff]  ;;  %v325_v38 = vld [vmem:[%s1703_s15 + $0x78] sm:$0xff] }
  0x6d   : > { %905 = vmatprep.subr.mxu0 %v335_v39  ;;  %976 = vmatprep.subr.mxu1 %v337_v40  ;;  %v322_v39 = vld [vmem:[%s1703_s15 + $0x60] sm:$0xff]  ;;  %v324_v40 = vld [vmem:[%s1703_s15 + $0x70] sm:$0xff]  ;;  %s1604_s15 = smov [#allocation2]  }
  0x6e   : > { %906 = vmatpush1.msra.mxu0 %v334_v41  ;;  %977 = vmatpush1.msra.mxu1 %v336_v42  ;;  %s1528_s16 = sshll.u32 %s1604_s15, 4  ;;  %s1529_s16 = int_to_ptr.vmem [resolvable:$false] %s1528_s16 }
  0x6f   : > { %907 = vmatprep.subr.mxu0 %v319_v43  ;;  %978 = vmatprep.subr.mxu1 %v321_v44  ;;  %s1530_s17 = scalar_lea.vmem %s1529_s16, 4096  ;;  %p1531_p1 = scmp.lt.s32.totalorder %s1271_s8, %s1529_s16 }
  0x70   : > { %908 = vmatpush1.msra.mxu0 %v318_v45  ;;  %941 = vmatprep.mubr.f32.mxu0 %v1602_v0  ;;  %p1532_p2 = scmp.lt.s32.totalorder %s1530_s17, %s1524_s14 }
  0x71   : > { %979 = vmatpush1.msra.mxu1 %v320_v46  ;;  %1449 = vmatmul.mubr.msk.f32.vlgmr.msra.gmra.mxu0 %vm540_vm1, %v1769_v59 }
  0x72   : > { %1012 = vmatprep.mubr.f32.mxu1 %v1602_v0  ;;  %1453 = vmatprep.subr.msk.mxu0 %vm544_vm0, %v531_v47  ;;  %p1533_p3 = por %p1532_p2, %p1531_p1 }
  0x73   : > { %1456 = vmatprep.subr.msk.mxu1 %vm544_vm0, %v533_v48  ;;  %1452 = vmatmul.mubr.msk.f32.vlgmr.msra.gmra.mxu1 %vm540_vm1, %v1769_v59 }
  0x74   : > { %1454 = vmatpush1.msk.msra.mxu0 %vm544_vm0, %v530_v49  ;;  %1457 = vmatpush1.msk.msra.mxu1 %vm544_vm0, %v532_v50  ;;  %p1534_p5 = pnand %p1533_p3, %p1527_p0 }
  0x75   : > { %1025 = vmatprep.subr.mxu0 %v515_v51  ;;  %1096 = vmatprep.subr.mxu1 %v517_v52 }
  0x76   : > { %1026 = vmatpush1.msra.mxu0 %v514_v53  ;;  %1097 = vmatpush1.msra.mxu1 %v516_v54 }
  0x77   : > { %1027 = vmatprep.subr.mxu0 %v499_v55  ;;  %1098 = vmatprep.subr.mxu1 %v501_v56 }
  0x78   : > { %1028 = vmatpush1.msra.mxu0 %v498_v57  ;;  %1099 = vmatpush1.msra.mxu1 %v500_v58 }
  0x79   : > { %1029 = vmatprep.subr.mxu0 %v483_v60  ;;  %1100 = vmatprep.subr.mxu1 %v485_v61 }
  0x7a   : > { %1030 = vmatpush1.msra.mxu0 %v482_v62  ;;  %1101 = vmatpush1.msra.mxu1 %v484_v63 }
  0x7b   : > { %1031 = vmatprep.subr.mxu0 %v467_v1  ;;  %1102 = vmatprep.subr.mxu1 %v469_v2 }
  0x7c   : > { %1032 = vmatpush1.msra.mxu0 %v466_v3  ;;  %1103 = vmatpush1.msra.mxu1 %v468_v4 }
  0x7d   : > { %1033 = vmatprep.subr.mxu0 %v451_v5  ;;  %1104 = vmatprep.subr.mxu1 %v453_v6 }
  0x7e   : > { %1034 = vmatpush1.msra.mxu0 %v450_v7  ;;  %1105 = vmatpush1.msra.mxu1 %v452_v8 }
  0x7f   : > { %1035 = vmatprep.subr.mxu0 %v435_v9  ;;  %1106 = vmatprep.subr.mxu1 %v437_v10 }
  0x80   : > { %1036 = vmatpush1.msra.mxu0 %v434_v11  ;;  %1107 = vmatpush1.msra.mxu1 %v436_v12 }
  0x81   : > { %1037 = vmatprep.subr.mxu0 %v419_v13  ;;  %1108 = vmatprep.subr.mxu1 %v421_v14 }
  0x82   : > { %1038 = vmatpush1.msra.mxu0 %v418_v15  ;;  %1109 = vmatpush1.msra.mxu1 %v420_v16 }
  0x83   : > { %1039 = vmatprep.subr.mxu0 %v403_v17  ;;  %1110 = vmatprep.subr.mxu1 %v405_v18 }
  0x84   : > { %1040 = vmatpush1.msra.mxu0 %v402_v19  ;;  %1111 = vmatpush1.msra.mxu1 %v404_v20 }
  0x85   : > { %1041 = vmatprep.subr.mxu0 %v387_v21  ;;  %1112 = vmatprep.subr.mxu1 %v389_v22 }
  0x86   : > { %1042 = vmatpush1.msra.mxu0 %v386_v23  ;;  %1113 = vmatpush1.msra.mxu1 %v388_v24 }
  0x87   : > { %1043 = vmatprep.subr.mxu0 %v371_v25  ;;  %1114 = vmatprep.subr.mxu1 %v373_v26 }
  0x88   : > { %1044 = vmatpush1.msra.mxu0 %v370_v27  ;;  %1115 = vmatpush1.msra.mxu1 %v372_v28 }
  0x89   : > { %1045 = vmatprep.subr.mxu0 %v355_v29  ;;  %1116 = vmatprep.subr.mxu1 %v357_v30 }
  0x8a   : > { %1046 = vmatpush1.msra.mxu0 %v354_v31  ;;  %1117 = vmatpush1.msra.mxu1 %v356_v32 }
  0x8b   : > { %1047 = vmatprep.subr.mxu0 %v339_v33  ;;  %1118 = vmatprep.subr.mxu1 %v341_v34 }
  0x8c   : > { %1048 = vmatpush1.msra.mxu0 %v338_v35  ;;  %1119 = vmatpush1.msra.mxu1 %v340_v36 }
  0x8d   : > { %1049 = vmatprep.subr.mxu0 %v323_v37  ;;  %1120 = vmatprep.subr.mxu1 %v325_v38 }
  0x8e   : > { %1050 = vmatpush1.msra.mxu0 %v322_v39  ;;  %1083 = vmatprep.mubr.f32.mxu0 %v1602_v0 }
  0x8f   : > { %1121 = vmatpush1.msra.mxu1 %v324_v40  ;;  %1154 = vmatprep.mubr.f32.mxu1 %v1602_v0 }
  0x90   : > { %1455 = vmatmul.mubr.msk.f32.vlgmr.msra.gmra.mxu0 %vm540_vm1, %v1769_v59  ;;  %1458 = vmatmul.mubr.msk.f32.vlgmr.msra.gmra.mxu1 %vm540_vm1, %v1769_v59 }
  0x94   : > { %v1976_v41 = vpop.permute.xlu0 %537 }
  0xf6   : > { %v659_v42 = vpop.f32.mrf.mxu0 }
  0xf7   : > { %v660_v43 = vadd.f32 %v659_v42, %v1976_v41  ;;  %v730_v44 = vpop.f32.mrf.mxu1 }
  0xf8   : > { %v661_v45 = vpop.f32.mrf.mxu0  ;;  %v731_v46 = vadd.f32 %v730_v44, %v1976_v41 }
  0xf9   : > { %v662_v0 = vadd.f32 %v661_v45, %v1976_v41  ;;  %1161 = vst [vmem:[%s1981_s29] sm:$0xff] %v660_v43  ;;  %v1194_v59 = vmul.f32 %v660_v43, %v660_v43  ;;  %v732_v47 = vpop.f32.mrf.mxu1 }
  0xfa   : > { %1163 = vst [vmem:[%s1981_s29 + $0x10] sm:$0xff] %v731_v46  ;;  %v733_v48 = vadd.f32 %v732_v47, %v1976_v41  ;;  %v1196_v51 = vmul.f32 %v731_v46, %v731_v46 }
  0xfb   : > { %1162 = vst [vmem:[%s1981_s29 + $0x8] sm:$0xff] %v662_v0  ;;  %v1177_v49 = vadd.f32 %v662_v0, %v660_v43  ;;  %v1195_v50 = vmul.f32 %v662_v0, %v662_v0 }
  0xfc   : > { %1164 = vst [vmem:[%s1981_s29 + $0x18] sm:$0xff] %v733_v48  ;;  %v1197_v54 = vmul.f32 %v733_v48, %v733_v48 }
  0xfd   : > { %v1210_v52 = vadd.f32 %v1195_v50, %v1194_v59  ;;  %v1178_v53 = vadd.f32 %v1177_v49, %v731_v46 }
  0xff   : > { %v1211_v55 = vadd.f32 %v1210_v52, %v1196_v51  ;;  %v1179_v56 = vadd.f32 %v1178_v53, %v733_v48 }
 0x101   : > { %v1212_v57 = vadd.f32 %v1211_v55, %v1197_v54 }
 0x113   : > { %v801_v58 = vpop.f32.mrf.mxu0 }
 0x114   : > { %v802_v60 = vadd.f32 %v801_v58, %v1976_v41 }
 0x115   : > { %v803_v61 = vpop.f32.mrf.mxu0  ;;  %v872_v62 = vpop.f32.mrf.mxu1 }
 0x116   : > { %1165 = vst [vmem:[%s1981_s29 + $0x20] sm:$0xff] %v802_v60  ;;  %v804_v63 = vadd.f32 %v803_v61, %v1976_v41  ;;  %v873_v1 = vadd.f32 %v872_v62, %v1976_v41  ;;  %v1198_v8 = vmul.f32 %v802_v60, %v802_v60  ;;  %v1180_v12 = vadd.f32 %v1179_v56, %v802_v60 }
 0x117   : > { %v874_v2 = vpop.f32.mrf.mxu1 }
 0x118   : > { %1166 = vst [vmem:[%s1981_s29 + $0x28] sm:$0xff] %v804_v63  ;;  %1167 = vst [vmem:[%s1981_s29 + $0x30] sm:$0xff] %v873_v1  ;;  %v875_v3 = vadd.f32 %v874_v2, %v1976_v41  ;;  %v1213_v14 = vadd.f32 %v1212_v57, %v1198_v8  ;;  %v1199_v15 = vmul.f32 %v804_v63, %v804_v63 }
 0x119   : > { %v1181_v16 = vadd.f32 %v1180_v12, %v804_v63  ;;  %v1200_v18 = vmul.f32 %v873_v1, %v873_v1 }
 0x11a   : > { %1168 = vst [vmem:[%s1981_s29 + $0x38] sm:$0xff] %v875_v3  ;;  %v1214_v17 = vadd.f32 %v1213_v14, %v1199_v15  ;;  %v1201_v21 = vmul.f32 %v875_v3, %v875_v3 }
 0x11b   : > { %v1182_v19 = vadd.f32 %v1181_v16, %v873_v1 }
 0x11c   : > { %v1215_v20 = vadd.f32 %v1214_v17, %v1200_v18 }
 0x11d   : > { %v1183_v23 = vadd.f32 %v1182_v19, %v875_v3 }
 0x11e   : > { %v1216_v24 = vadd.f32 %v1215_v20, %v1201_v21 }
 0x131   : > { %v943_v4 = vpop.f32.mrf.mxu0 }
 0x132   : > { %v944_v5 = vadd.f32 %v943_v4, %v1976_v41 }
 0x133   : > { %v945_v6 = vpop.f32.mrf.mxu0  ;;  %v1014_v7 = vpop.f32.mrf.mxu1 }
 0x134   : > { %1169 = vst [vmem:[%s1981_s29 + $0x40] sm:$0xff] %v944_v5  ;;  %v946_v9 = vadd.f32 %v945_v6, %v1976_v41  ;;  %v1015_v10 = vadd.f32 %v1014_v7, %v1976_v41  ;;  %v1202_v22 = vmul.f32 %v944_v5, %v944_v5  ;;  %v1184_v25 = vadd.f32 %v1183_v23, %v944_v5 }
 0x135   : > { %v1016_v11 = vpop.f32.mrf.mxu1 }
 0x136   : > { %1170 = vst [vmem:[%s1981_s29 + $0x48] sm:$0xff] %v946_v9  ;;  %1171 = vst [vmem:[%s1981_s29 + $0x50] sm:$0xff] %v1015_v10  ;;  %v1017_v13 = vadd.f32 %v1016_v11, %v1976_v41  ;;  %v1217_v26 = vadd.f32 %v1216_v24, %v1202_v22  ;;  %v1203_v27 = vmul.f32 %v946_v9, %v946_v9 }
 0x137   : > { %v1185_v28 = vadd.f32 %v1184_v25, %v946_v9  ;;  %v1204_v30 = vmul.f32 %v1015_v10, %v1015_v10 }
 0x138   : > { %1172 = vst [vmem:[%s1981_s29 + $0x58] sm:$0xff] %v1017_v13  ;;  %v1218_v29 = vadd.f32 %v1217_v26, %v1203_v27  ;;  %v1205_v33 = vmul.f32 %v1017_v13, %v1017_v13 }
 0x139   : > { %v1186_v31 = vadd.f32 %v1185_v28, %v1015_v10 }
 0x13a   : > { %v1219_v32 = vadd.f32 %v1218_v29, %v1204_v30 }
 0x13b   : > { %v1187_v36 = vadd.f32 %v1186_v31, %v1017_v13 }
 0x13c   : > { %v1220_v39 = vadd.f32 %v1219_v32, %v1205_v33 }
 0x150   : > { %v1085_v34 = vpop.f32.mrf.mxu0  ;;  %v1156_v35 = vpop.f32.mrf.mxu1 }
 0x151   : > { %v1086_v37 = vadd.f32 %v1085_v34, %v1976_v41  ;;  %v1157_v38 = vadd.f32 %v1156_v35, %v1976_v41 }
 0x152   : > { %v1087_v40 = vpop.f32.mrf.mxu0  ;;  %v1158_v42 = vpop.f32.mrf.mxu1 }
 0x153   : > { %1173 = vst [vmem:[%s1981_s29 + $0x60] sm:$0xff] %v1086_v37  ;;  %v1188_v43 = vadd.f32 %v1187_v36, %v1086_v37  ;;  %v1206_v44 = vmul.f32 %v1086_v37, %v1086_v37  ;;  %1175 = vst [vmem:[%s1981_s29 + $0x70] sm:$0xff] %v1157_v38  ;;  %v1088_v45 = vadd.f32 %v1087_v40, %v1976_v41 }
 0x154   : > { %v1159_v46 = vadd.f32 %v1158_v42, %v1976_v41  ;;  %v1208_v49 = vmul.f32 %v1157_v38, %v1157_v38 }
 0x155   : > { %1174 = vst [vmem:[%s1981_s29 + $0x68] sm:$0xff] %v1088_v45  ;;  %v1189_v0 = vadd.f32 %v1188_v43, %v1088_v45  ;;  %v1207_v59 = vmul.f32 %v1088_v45, %v1088_v45  ;;  %v1221_v47 = vadd.f32 %v1220_v39, %v1206_v44 }
 0x156   : > { %1176 = vst [vmem:[%s1981_s29 + $0x78] sm:$0xff] %v1159_v46  ;;  %v1209_v52 = vmul.f32 %v1159_v46, %v1159_v46 }
 0x157   : > { %v1190_v48 = vadd.f32 %v1189_v0, %v1157_v38  ;;  %v1222_v50 = vadd.f32 %v1221_v47, %v1207_v59 }
 0x159   : > { %v1191_v51 = vadd.f32 %v1190_v48, %v1159_v46  ;;  %v1223_v53 = vadd.f32 %v1222_v50, %v1208_v49 }
 0x15b   : > { %1192 = vadd.xlane.f32.xlu0 %v1191_v51  ;;  %v1224_v54 = vadd.f32 %v1223_v53, %v1209_v52 }
 0x15d   : > { %1225 = vadd.xlane.f32.xlu1 %v1224_v54 }
 0x15e   : > { %1537 = shalt.err (!%p1534_p5)
}
 0x15f   : > { %s1538_s21 = scalar_lea.hbm %s1268_s12, 2048  ;;  %s1542_s27 = scalar_lea.hbm %s2064_s3, 4096 }
 0x160   : > { %p1539_p6 = scmp.ne.s32.totalorder %s1268_s12, %s1538_s21  ;;  %p1543_p10 = scmp.lt.s32.totalorder %s1268_s12, %s2064_s3 }
 0x161   : > { %p1544_p11 = scmp.lt.s32.totalorder %s1542_s27, %s1538_s21 }
 0x162   : > { %p1540_p7 = pnand %p1539_p6, %p1675_p4 }
 0x163   : > { %p1545_p12 = por %p1544_p11, %p1543_p10 }
 0x164   : > { %p1541_p9 = pneg %p1540_p7 }
 0x166   : > { %p1546_p13 = pnand %p1545_p12, %p1541_p9 }
 0x168   : > { %1549 = shalt.err (!%p1546_p13)
}
 0x169   : > { %1466 = dma.vmem_to_hbm [thread:$0]  (%p1675_p4), %s1271_s8, 2048, %s1268_s12, %s1246_s13   ;;  %vm1231_vm2 = vcmask 7168  }
 0x16a   : > { %s304_s14 = scalar_lea.vmem %s2065_s4, %s1694_s9  ;;  %s308_s17 = scalar_lea.vmem %s2066_s5, %s1694_s9 }
 0x1e4   : > { %v1193_v41 = vpop.xlane.xlu0 %1192 }
 0x1e5   : > { %1232 = vst.msk [vmem:[%s304_s14] sm:$0xff] %vm1231_vm2, %v1193_v41 }
 0x1e6   : > { %v1226_v55 = vpop.xlane.xlu1 %1225 }
 0x1e7   : > { %1233 = vst.msk [vmem:[%s308_s17] sm:$0xff] %vm1231_vm2, %v1226_v55 }
 0x1e8 PF: > { %p1472_p0 = scmp.ge.s32.totalorder %s1600_s23, 2  ;;  %s1288_s28 = sand.u32 1, %s1580_s18  }
 0x1e9   : > { %s1289_s8 = scalar_lea.sflag [#allocation3], %s1288_s28 }
 0x1ea   : > { %p1469_p4 = pnand %p1472_p0, %p1682_p8 }
 0x1ec   : > { %p1470_p1 = pneg %p1469_p4 }
 0x1ee   : > { %1575 = dma.done.wait (%p1470_p1), %s1289_s8, 2048  }
 0x1ef   : > { %1577 = vsyncadd (%p1470_p1), %s1289_s8, 4294965248  ;;  %s19_s23 = sadd.s32 1, %s1600_s23   ;;  %s2069_s18 = smov %s1584_s19 }
 0x1f0   : > { %p16_p2 = scmp.ge.s32.totalorder %s19_s23, 4   ;;  %s2070_s19 = smov %s1588_s20 }
 0x1f1   : > { %s2071_s20 = smov %s1688_s6  ;;  %s2072_s21 = smov %s1596_s22 }
 0x1f2   : > { %s2073_s22 = smov %s2075_s26  ;;  %18 = sbr.rel (!%p16_p2) target bundleno = 4 (0x4), region = 105 }
 0x1f7   :  { %1308 = vsyncpa [#allocation3], 1 }
 0x1f8   :  { %1310 = vsyncpa [#allocation3 + $0x1], 1 }

</bundles_post_ra>
